<compile_context>
chip_gen: v6e
topology: v6e:2x2x1
jax: 0.10.0
libtpu: 0.0.40
codegen_flags: <defaults>
</compile_context>

<pallas_src>
import functools
import math

import jax
import jax.numpy as jnp
from jax.experimental import pallas as pl
from jax.experimental.pallas import tpu as pltpu


def _round_up(x, m):
    return (x + m - 1) // m * m


def _vmem_capacity_bytes():
    try:
        return int(pltpu.get_tpu_info().vmem_capacity_bytes)
    except Exception:
        return 64 * 1024 * 1024   # conservative (v7x per-TC capacity)


def _choose_tiling(n, d, itemsize):
    """Pick (tn, num_tiles, n_pad) from the per-chip VMEM budget."""
    vmem = _vmem_capacity_bytes()
    budget = vmem // 3                                   # double-buffered x tile budget
    tn_cap = max(8, (budget // (2 * d * itemsize)) // 8 * 8)
    tn = int(min(1024, tn_cap))                          # 1024 amortizes grid-step overhead
    n_pad = _round_up(n, 8)
    tn = min(tn, n_pad)
    tiles = -(-n_pad // tn)
    # v7x has 2 TensorCores: make the "parallel" axis an even number of
    # balanced tiles whenever the problem is big enough to split.
    if n_pad >= 16:
        tiles = max(tiles, 2)
        if tiles % 2:
            tiles += 1
    tn = _round_up(-(-n_pad // tiles), 8)
    n_pad = tn * tiles
    return tn, tiles, n_pad


def _vmem_limit_bytes(tn, d, n_exp, top_k, training):
    vmem = _vmem_capacity_bytes()
    x_bytes = 2 * tn * d * 2                 # double-buffered bf16 token tile
    w_bytes = 2 * d * n_exp * 2              # double-buffered bf16 weight
    out_bytes = 2 * (tn * top_k * 4) * 2     # tw + ti, double-buffered
    stat_bytes = (2 * (8 * n_exp * 4) * 2) if training else 0
    headroom = 16 * 1024 * 1024              # compute intermediates / spills
    return int(min(vmem, x_bytes + w_bytes + out_bytes + stat_bytes + headroom))


# ---------------------------------------------------------------------------
# Pallas kernel: bf16 gate matmul + f32 softmax + fused top-k
# (+ per-tile score sum & top-k expert histogram, training only)
# ---------------------------------------------------------------------------
def _gate_topk_kernel(x_ref, w_ref, tw_ref, ti_ref, *stat_refs,
                      top_k, n_tokens, norm_topk_prob, training):
    tn = x_ref.shape[0]
    n_exp = w_ref.shape[1]

    # MXU matmul: bf16 inputs (x arrives bf16, weight is pre-cast / pre-transposed
    # contraction-major (d, E)), f32 accumulation.
    logits = jnp.dot(x_ref[...], w_ref[...], preferred_element_type=jnp.float32)   # (tn, E)

    # Numerically-stable softmax numerator in f32.  Normalization is deferred:
    # dividing a row by its positive sum does not change ordering, so top-k runs
    # on the unnormalized exp and only the (tn, k) selected values get scaled.
    m = jnp.max(logits, axis=-1, keepdims=True)
    e = jnp.exp(logits - m)                                                         # (tn, E)
    inv_denom = pl.reciprocal(jnp.sum(e, axis=-1, keepdims=True), approx=True)      # (tn, 1)

    eid = jax.lax.broadcasted_iota(jnp.int32, (tn, n_exp), 1)
    colk = jax.lax.broadcasted_iota(jnp.int32, (tn, top_k), 1)

    if training:
        ssum_ref, hist_ref = stat_refs
        row = pl.program_id(0) * tn + jax.lax.broadcasted_iota(jnp.int32, (tn, 1), 0)
        valid = row < n_tokens
        # Pi partial: per-tile column sum of normalized scores over valid tokens,
        # replicated across 8 sublanes so the output block is (8, E)-shaped.
        scores = e * inv_denom
        col_sum = jnp.sum(jnp.where(valid, scores, 0.0), axis=0, keepdims=True)     # (1, E)
        ssum_ref[0] = jnp.broadcast_to(col_sum, (8, n_exp))
        hist = jnp.zeros((1, n_exp), jnp.float32)

    # Iterative top-k (k small & static): max + lowest-index argmax, mask, repeat.
    tw = jnp.zeros((tn, top_k), jnp.float32)
    ti = jnp.zeros((tn, top_k), jnp.int32)
    s = e
    for j in range(top_k):
        mj = jnp.max(s, axis=-1, keepdims=True)                                     # (tn, 1)
        ij = jnp.min(jnp.where(s == mj, eid, n_exp), axis=-1, keepdims=True)        # (tn, 1)
        tw = jnp.where(colk == j, mj, tw)
        ti = jnp.where(colk == j, ij, ti)
        onehot = eid == ij                                                           # (tn, E)
        if training:
            hist = hist + jnp.sum(jnp.where(valid & onehot, 1.0, 0.0),
                                  axis=0, keepdims=True)
        s = jnp.where(onehot, -jnp.inf, s)

    if training:
        hist_ref[0] = jnp.broadcast_to(hist, (8, n_exp))

    # Scale only the k selected values back to probabilities (EUP reciprocal).
    tw = tw * inv_denom
    if norm_topk_prob and top_k > 1:
        tw = tw * pl.reciprocal(jnp.sum(tw, axis=-1, keepdims=True) + 1e-20, approx=True)

    tw_ref[...] = tw
    ti_ref[...] = ti


def gate_topk_pallas(flat_x, gate_w_t, *, top_k, norm_topk_prob=False, with_stats=False):
    """flat_x: (N, d) bf16; gate_w_t: (d, E) bf16 (pre-transposed gate weight).

    Returns (topk_weight (N,k) f32, topk_idx (N,k) i32[, ssum (G,8,E), hist (G,8,E)]).
    """
    n, d = flat_x.shape
    n_exp = gate_w_t.shape[1]

    tn, tiles, n_pad = _choose_tiling(n, d, flat_x.dtype.itemsize)
    if n_pad != n:
        flat_x = jnp.pad(flat_x, ((0, n_pad - n), (0, 0)))
    grid = (tiles,)

    kernel = functools.partial(
        _gate_topk_kernel, top_k=top_k, n_tokens=n,
        norm_topk_prob=norm_topk_prob, training=with_stats)

    out_shape = [
        jax.ShapeDtypeStruct((n_pad, top_k), jnp.float32),
        jax.ShapeDtypeStruct((n_pad, top_k), jnp.int32),
    ]
    out_specs = [
        pl.BlockSpec((tn, top_k), lambda i: (i, 0)),
        pl.BlockSpec((tn, top_k), lambda i: (i, 0)),
    ]
    if with_stats:
        out_shape += [jax.ShapeDtypeStruct((tiles, 8, n_exp), jnp.float32)] * 2
        out_specs += [pl.BlockSpec((1, 8, n_exp), lambda i: (i, 0, 0))] * 2

    outs = pl.pallas_call(
        kernel,
        out_shape=tuple(out_shape),
        grid=grid,
        in_specs=[
            pl.BlockSpec((tn, d), lambda i: (i, 0)),       # bf16 token tile (pipelined)
            pl.BlockSpec((d, n_exp), lambda i: (0, 0)),    # full (d, E) weight, reused
        ],
        out_specs=tuple(out_specs),
        compiler_params=pltpu.CompilerParams(
            dimension_semantics=("parallel",),
            vmem_limit_bytes=_vmem_limit_bytes(tn, d, n_exp, top_k, with_stats)),
    )(flat_x, gate_w_t)

    if with_stats:
        tw, ti, ssum, hist = outs
        return tw[:n], ti[:n], ssum, hist
    tw, ti = outs
    return tw[:n], ti[:n]


# ---------------------------------------------------------------------------
# Parameters (deterministic, synthetic) — matches kaiming_uniform_(a=sqrt(5))
# ---------------------------------------------------------------------------
def init_gate_params(key, embed_dim, num_experts=16):
    bound = 1.0 / math.sqrt(embed_dim)
    w = jax.random.uniform(key, (num_experts, embed_dim), jnp.float32, -bound, bound)
    # Pre-transpose + bf16-cast once, outside the hot path: contraction-major
    # (d, E) layout feeds the MXU without an in-kernel relayout.
    return {"gate_w": w, "gate_w_t": jnp.asarray(w.T, jnp.bfloat16)}


# ---------------------------------------------------------------------------
# Forward (TC_MoEGate.forward)
# ---------------------------------------------------------------------------
@functools.partial(jax.jit,
                   static_argnames=("top_k", "norm_topk_prob", "training", "alpha"))
def tc_moe_gate(hidden_states, gate_w_t, *, top_k=2, norm_topk_prob=False,
                training=False, alpha=0.01):
    b, s, h = hidden_states.shape
    flat_x = hidden_states.reshape(b * s, h)
    if flat_x.dtype != jnp.bfloat16:
        # Ideally the producer already emits bf16 so the dominant HBM stream is
        # half-width end-to-end; cast once here otherwise.
        flat_x = flat_x.astype(jnp.bfloat16)

    compute_stats = training and alpha > 0.0
    if compute_stats:
        topk_weight, topk_idx, score_sum, topk_hist = gate_topk_pallas(
            flat_x, gate_w_t, top_k=top_k, norm_topk_prob=norm_topk_prob,
            with_stats=True)
        n_exp = gate_w_t.shape[1]
        n_tok = b * s
        # Pi = scores.mean(0), assembled from per-tile kernel partial sums.
        pi = score_sum[:, 0, :].sum(axis=0) / n_tok                       # (E,)
        # ce = one_hot(topk_idx).float().mean(0); fi = ce * E   (non-seq_aux path)
        ce = topk_hist[:, 0, :].sum(axis=0) / (n_tok * top_k)             # (E,)
        fi = ce * n_exp
        aux_loss = jnp.sum(pi * fi) * alpha
    else:
        topk_weight, topk_idx = gate_topk_pallas(
            flat_x, gate_w_t, top_k=top_k, norm_topk_prob=norm_topk_prob,
            with_stats=False)
        aux_loss = None

    return topk_idx, topk_weight, aux_loss


# ---------------------------------------------------------------------------
# Pure-JAX reference (same bf16 inputs) for a sanity check
# ---------------------------------------------------------------------------
def _reference(flat_x_bf16, gate_w_t_bf16, *, top_k, alpha, training, norm_topk_prob):
    logits = jnp.dot(flat_x_bf16, gate_w_t_bf16, preferred_element_type=jnp.float32)
    scores = jax.nn.softmax(logits, axis=-1)
    tw, ti = jax.lax.top_k(scores, top_k)
    if norm_topk_prob and top_k > 1:
        tw = tw / (tw.sum(-1, keepdims=True) + 1e-20)
    aux = None
    if training and alpha > 0.0:
        n_exp = gate_w_t_bf16.shape[1]
        pi = scores.mean(axis=0)
        ce = jax.nn.one_hot(ti.reshape(-1), n_exp, dtype=jnp.float32).mean(axis=0)
        aux = jnp.sum(pi * (ce * n_exp)) * alpha
    return ti, tw, aux


# ---------------------------------------------------------------------------
if __name__ == "__main__":
    B, S, d = 2, 16, 32
    num_experts, top_k = 16, 2

    key = jax.random.PRNGKey(0)
    kx, kw = jax.random.split(key)
    # Producer emits bf16 directly (halves the dominant HBM stream).
    x = jax.random.normal(kx, (B, S, d), jnp.float32).astype(jnp.bfloat16)
    params = init_gate_params(kw, d, num_experts)

    # training path (aux loss computed, as PyTorch default self.training=True)
    topk_idx, topk_w, aux = tc_moe_gate(x, params["gate_w_t"], top_k=top_k,
                                        training=True, alpha=0.01)
    jax.block_until_ready((topk_idx, topk_w, aux))
    assert topk_idx.shape == (B * S, top_k) and topk_idx.dtype == jnp.int32
    assert topk_w.shape == (B * S, top_k) and topk_w.dtype == jnp.float32
    assert aux.shape == () and bool(jnp.isfinite(aux))

    # eval path (aux_loss is None, as in the reference when not training)
    ti2, tw2, aux2 = tc_moe_gate(x, params["gate_w_t"], top_k=top_k, training=False)
    jax.block_until_ready((ti2, tw2))
    assert aux2 is None
    # sanity: probabilities in (0, 1] (small slack for EUP approx reciprocal),
    # sorted descending, valid expert ids
    assert bool(jnp.all((tw2 > 0.0) & (tw2 <= 1.0 + 1e-2)))
    assert bool(jnp.all(tw2[:, 0] >= tw2[:, 1]))
    assert bool(jnp.all((ti2 >= 0) & (ti2 < num_experts)))

    # reference check (same bf16 inputs; loose tolerances cover MXU vs XLA
    # rounding + approx reciprocal; ties may reorder indices)
    ref_ti, ref_tw, ref_aux = _reference(
        x.reshape(B * S, d), params["gate_w_t"], top_k=top_k, alpha=0.01,
        training=True, norm_topk_prob=False)
    assert bool(jnp.allclose(topk_w, ref_tw, atol=2e-2))
    assert float(jnp.mean((topk_idx == ref_ti).astype(jnp.float32))) >= 0.9
    assert bool(jnp.allclose(aux, ref_aux, atol=5e-3, rtol=5e-2))

    print("KERNEL_OK")
</pallas_src>

<mosaic_0001>
module attributes {stable_mosaic.version = 11 : i64} {
  func.func @_gate_topk_kernel(%arg0: i32, %arg1: memref<16x32xbf16, #tpu.memory_space<vmem>>, %arg2: memref<32x16xbf16, #tpu.memory_space<vmem>>, %arg3: memref<16x2xf32, #tpu.memory_space<vmem>>, %arg4: memref<16x2xi32, #tpu.memory_space<vmem>>, %arg5: memref<1x8x16xf32, #tpu.memory_space<vmem>>, %arg6: memref<1x8x16xf32, #tpu.memory_space<vmem>>) attributes {dimension_semantics = [#tpu.dimension_semantics<parallel>], iteration_bounds = array<i64: 2>, scalar_prefetch = 0 : i64, scratch_operands = 0 : i64, tpu.core_type = #tpu.core_type<tc>, window_params = [{transform_indices = @transform_0, window_bounds = array<i64: 16, 32>}, {pipeline_mode = #tpu.pipeline_mode<synchronous>, transform_indices = @transform_1, window_bounds = array<i64: 32, 16>}, {transform_indices = @transform_2, window_bounds = array<i64: 16, 2>}, {transform_indices = @transform_3, window_bounds = array<i64: 16, 2>}, {transform_indices = @transform_4, window_bounds = array<i64: 1, 8, 16>}, {transform_indices = @transform_5, window_bounds = array<i64: 1, 8, 16>}]} {
    %c0 = arith.constant 0 : index
    %c0_0 = arith.constant 0 : index
    %0 = vector.load %arg1[%c0, %c0_0] : memref<16x32xbf16, #tpu.memory_space<vmem>>, vector<16x32xbf16>
    %c0_1 = arith.constant 0 : index
    %c0_2 = arith.constant 0 : index
    %1 = vector.load %arg2[%c0_1, %c0_2] : memref<32x16xbf16, #tpu.memory_space<vmem>>, vector<32x16xbf16>
    %cst = arith.constant dense<0.000000e+00> : vector<16x16xf32>
    %2 = tpu.matmul %0, %1, %cst {dimension_numbers = #tpu.dot_dimension_numbers<[1], [0], [0], [1], [0, 0, 1, 1], [], []>} : vector<16x32xbf16>, vector<32x16xbf16>, vector<16x16xf32> -> vector<16x16xf32>
    %cst_3 = arith.constant dense<0xFF800000> : vector<16xf32>
    %3 = vector.multi_reduction <maximumf>, %2, %cst_3 [1] : vector<16x16xf32> to vector<16xf32>
    %4 = vector.shape_cast %3 : vector<16xf32> to vector<16x1xf32>
    %5 = vector.broadcast %4 : vector<16x1xf32> to vector<16x16xf32>
    %6 = arith.subf %2, %5 : vector<16x16xf32>
    %7 = math.exp %6 : vector<16x16xf32>
    %cst_4 = arith.constant dense<0.000000e+00> : vector<16xf32>
    %8 = vector.multi_reduction <add>, %7, %cst_4 [1] : vector<16x16xf32> to vector<16xf32>
    %9 = vector.shape_cast %8 : vector<16xf32> to vector<16x1xf32>
    %10 = tpu.reciprocal %9 {approx = true} : vector<16x1xf32> -> vector<16x1xf32>
    %11 = tpu.iota {dimensions = array<i32: 1>} : vector<16x16xi32>
    %12 = tpu.iota {dimensions = array<i32: 1>} : vector<16x2xi32>
    %c16_i32 = arith.constant 16 : i32
    %13 = arith.muli %arg0, %c16_i32 : i32
    %14 = tpu.iota {dimensions = array<i32: 0>} : vector<16x1xi32>
    %15 = vector.broadcast %13 : i32 to vector<16x1xi32>
    %16 = arith.addi %15, %14 : vector<16x1xi32>
    %c32_i32 = arith.constant 32 : i32
    %17 = vector.broadcast %c32_i32 : i32 to vector<16x1xi32>
    %18 = arith.cmpi slt, %16, %17 : vector<16x1xi32>
    %19 = vector.broadcast %10 : vector<16x1xf32> to vector<16x16xf32>
    %20 = arith.mulf %7, %19 : vector<16x16xf32>
    %cst_5 = arith.constant 0.000000e+00 : f32
    %21 = vector.shape_cast %18 : vector<16x1xi1> to vector<16x1xi1>
    %22 = vector.broadcast %21 : vector<16x1xi1> to vector<16x16xi1>
    %23 = vector.broadcast %cst_5 : f32 to vector<16x16xf32>
    %24 = arith.select %22, %20, %23 : vector<16x16xi1>, vector<16x16xf32>
    %cst_6 = arith.constant dense<0.000000e+00> : vector<16xf32>
    %25 = vector.multi_reduction <add>, %24, %cst_6 [0] : vector<16x16xf32> to vector<16xf32>
    %26 = vector.shape_cast %25 : vector<16xf32> to vector<1x16xf32>
    %27 = vector.shape_cast %26 : vector<1x16xf32> to vector<1x16xf32>
    %28 = vector.broadcast %27 : vector<1x16xf32> to vector<8x16xf32>
    %c0_7 = arith.constant 0 : index
    %c0_8 = arith.constant 0 : index
    %c0_9 = arith.constant 0 : index
    %29 = vector.load %arg5[%c0_7, %c0_8, %c0_9] : memref<1x8x16xf32, #tpu.memory_space<vmem>>, vector<1x8x16xf32>
    %30 = vector.shape_cast %29 : vector<1x8x16xf32> to vector<8x16xf32>
    %31 = vector.shape_cast %28 : vector<8x16xf32> to vector<1x8x16xf32>
    tpu.vector_store %arg5[%c0_7, %c0_8, %c0_9], %31 {strides = array<i32>} : memref<1x8x16xf32, #tpu.memory_space<vmem>>, vector<1x8x16xf32>,
    %cst_10 = arith.constant 0.000000e+00 : f32
    %32 = vector.broadcast %cst_10 : f32 to vector<1x16xf32>
    %cst_11 = arith.constant 0.000000e+00 : f32
    %33 = vector.broadcast %cst_11 : f32 to vector<16x2xf32>
    %c0_i32 = arith.constant 0 : i32
    %34 = vector.broadcast %c0_i32 : i32 to vector<16x2xi32>
    %cst_12 = arith.constant dense<0xFF800000> : vector<16xf32>
    %35 = vector.multi_reduction <maximumf>, %7, %cst_12 [1] : vector<16x16xf32> to vector<16xf32>
    %36 = vector.shape_cast %35 : vector<16xf32> to vector<16x1xf32>
    %37 = vector.broadcast %36 : vector<16x1xf32> to vector<16x16xf32>
    %38 = arith.cmpf oeq, %7, %37 : vector<16x16xf32>
    %c16_i32_13 = arith.constant 16 : i32
    %39 = vector.broadcast %c16_i32_13 : i32 to vector<16x16xi32>
    %40 = arith.select %38, %11, %39 : vector<16x16xi1>, vector<16x16xi32>
    %cst_14 = arith.constant dense<2147483647> : vector<16xi32>
    %41 = vector.multi_reduction <minsi>, %40, %cst_14 [1] : vector<16x16xi32> to vector<16xi32>
    %42 = vector.shape_cast %41 : vector<16xi32> to vector<16x1xi32>
    %c0_i32_15 = arith.constant 0 : i32
    %43 = vector.broadcast %c0_i32_15 : i32 to vector<16x2xi32>
    %44 = arith.cmpi eq, %12, %43 : vector<16x2xi32>
    %45 = vector.shape_cast %36 : vector<16x1xf32> to vector<16x1xf32>
    %46 = vector.broadcast %45 : vector<16x1xf32> to vector<16x2xf32>
    %47 = arith.select %44, %46, %33 : vector<16x2xi1>, vector<16x2xf32>
    %c0_i32_16 = arith.constant 0 : i32
    %48 = vector.broadcast %c0_i32_16 : i32 to vector<16x2xi32>
    %49 = arith.cmpi eq, %12, %48 : vector<16x2xi32>
    %50 = vector.shape_cast %42 : vector<16x1xi32> to vector<16x1xi32>
    %51 = vector.broadcast %50 : vector<16x1xi32> to vector<16x2xi32>
    %52 = arith.select %49, %51, %34 : vector<16x2xi1>, vector<16x2xi32>
    %53 = vector.broadcast %42 : vector<16x1xi32> to vector<16x16xi32>
    %54 = arith.cmpi eq, %11, %53 : vector<16x16xi32>
    %55 = vector.broadcast %18 : vector<16x1xi1> to vector<16x16xi1>
    %56 = arith.andi %55, %54 : vector<16x16xi1>
    %cst_17 = arith.constant 1.000000e+00 : f32
    %cst_18 = arith.constant 0.000000e+00 : f32
    %57 = vector.broadcast %cst_17 : f32 to vector<16x16xf32>
    %58 = vector.broadcast %cst_18 : f32 to vector<16x16xf32>
    %59 = arith.select %56, %57, %58 : vector<16x16xi1>, vector<16x16xf32>
    %cst_19 = arith.constant dense<0.000000e+00> : vector<16xf32>
    %60 = vector.multi_reduction <add>, %59, %cst_19 [0] : vector<16x16xf32> to vector<16xf32>
    %61 = vector.shape_cast %60 : vector<16xf32> to vector<1x16xf32>
    %62 = arith.addf %32, %61 : vector<1x16xf32>
    %cst_20 = arith.constant 0xFF800000 : f32
    %63 = vector.broadcast %cst_20 : f32 to vector<16x16xf32>
    %64 = arith.select %54, %63, %7 : vector<16x16xi1>, vector<16x16xf32>
    %cst_21 = arith.constant dense<0xFF800000> : vector<16xf32>
    %65 = vector.multi_reduction <maximumf>, %64, %cst_21 [1] : vector<16x16xf32> to vector<16xf32>
    %66 = vector.shape_cast %65 : vector<16xf32> to vector<16x1xf32>
    %67 = vector.broadcast %66 : vector<16x1xf32> to vector<16x16xf32>
    %68 = arith.cmpf oeq, %64, %67 : vector<16x16xf32>
    %c16_i32_22 = arith.constant 16 : i32
    %69 = vector.broadcast %c16_i32_22 : i32 to vector<16x16xi32>
    %70 = arith.select %68, %11, %69 : vector<16x16xi1>, vector<16x16xi32>
    %cst_23 = arith.constant dense<2147483647> : vector<16xi32>
    %71 = vector.multi_reduction <minsi>, %70, %cst_23 [1] : vector<16x16xi32> to vector<16xi32>
    %72 = vector.shape_cast %71 : vector<16xi32> to vector<16x1xi32>
    %c1_i32 = arith.constant 1 : i32
    %73 = vector.broadcast %c1_i32 : i32 to vector<16x2xi32>
    %74 = arith.cmpi eq, %12, %73 : vector<16x2xi32>
    %75 = vector.shape_cast %66 : vector<16x1xf32> to vector<16x1xf32>
    %76 = vector.broadcast %75 : vector<16x1xf32> to vector<16x2xf32>
    %77 = arith.select %74, %76, %47 : vector<16x2xi1>, vector<16x2xf32>
    %c1_i32_24 = arith.constant 1 : i32
    %78 = vector.broadcast %c1_i32_24 : i32 to vector<16x2xi32>
    %79 = arith.cmpi eq, %12, %78 : vector<16x2xi32>
    %80 = vector.shape_cast %72 : vector<16x1xi32> to vector<16x1xi32>
    %81 = vector.broadcast %80 : vector<16x1xi32> to vector<16x2xi32>
    %82 = arith.select %79, %81, %52 : vector<16x2xi1>, vector<16x2xi32>
    %83 = vector.broadcast %72 : vector<16x1xi32> to vector<16x16xi32>
    %84 = arith.cmpi eq, %11, %83 : vector<16x16xi32>
    %85 = vector.broadcast %18 : vector<16x1xi1> to vector<16x16xi1>
    %86 = arith.andi %85, %84 : vector<16x16xi1>
    %cst_25 = arith.constant 1.000000e+00 : f32
    %cst_26 = arith.constant 0.000000e+00 : f32
    %87 = vector.broadcast %cst_25 : f32 to vector<16x16xf32>
    %88 = vector.broadcast %cst_26 : f32 to vector<16x16xf32>
    %89 = arith.select %86, %87, %88 : vector<16x16xi1>, vector<16x16xf32>
    %cst_27 = arith.constant dense<0.000000e+00> : vector<16xf32>
    %90 = vector.multi_reduction <add>, %89, %cst_27 [0] : vector<16x16xf32> to vector<16xf32>
    %91 = vector.shape_cast %90 : vector<16xf32> to vector<1x16xf32>
    %92 = arith.addf %62, %91 : vector<1x16xf32>
    %93 = vector.shape_cast %92 : vector<1x16xf32> to vector<1x16xf32>
    %94 = vector.broadcast %93 : vector<1x16xf32> to vector<8x16xf32>
    %c0_28 = arith.constant 0 : index
    %c0_29 = arith.constant 0 : index
    %c0_30 = arith.constant 0 : index
    %95 = vector.load %arg6[%c0_28, %c0_29, %c0_30] : memref<1x8x16xf32, #tpu.memory_space<vmem>>, vector<1x8x16xf32>
    %96 = vector.shape_cast %95 : vector<1x8x16xf32> to vector<8x16xf32>
    %97 = vector.shape_cast %94 : vector<8x16xf32> to vector<1x8x16xf32>
    tpu.vector_store %arg6[%c0_28, %c0_29, %c0_30], %97 {strides = array<i32>} : memref<1x8x16xf32, #tpu.memory_space<vmem>>, vector<1x8x16xf32>,
    %98 = vector.broadcast %10 : vector<16x1xf32> to vector<16x2xf32>
    %99 = arith.mulf %77, %98 : vector<16x2xf32>
    %c0_31 = arith.constant 0 : index
    %c0_32 = arith.constant 0 : index
    %100 = vector.load %arg3[%c0_31, %c0_32] : memref<16x2xf32, #tpu.memory_space<vmem>>, vector<16x2xf32>
    tpu.vector_store %arg3[%c0_31, %c0_32], %99 {strides = array<i32>} : memref<16x2xf32, #tpu.memory_space<vmem>>, vector<16x2xf32>,
    %c0_33 = arith.constant 0 : index
    %c0_34 = arith.constant 0 : index
    %101 = vector.load %arg4[%c0_33, %c0_34] : memref<16x2xi32, #tpu.memory_space<vmem>>, vector<16x2xi32>
    tpu.vector_store %arg4[%c0_33, %c0_34], %82 {strides = array<i32>} : memref<16x2xi32, #tpu.memory_space<vmem>>, vector<16x2xi32>,
    return
  }
  func.func @transform_0(%arg0: i32) -> (i32, i32) {
    %c0_i32 = arith.constant 0 : i32
    %c0_i32_0 = arith.constant 0 : i32
    return %arg0, %c0_i32 : i32, i32
  }
  func.func @transform_1(%arg0: i32) -> (i32, i32) {
    %c0_i32 = arith.constant 0 : i32
    %c0_i32_0 = arith.constant 0 : i32
    %c0_i32_1 = arith.constant 0 : i32
    return %c0_i32, %c0_i32_0 : i32, i32
  }
  func.func @transform_2(%arg0: i32) -> (i32, i32) {
    %c0_i32 = arith.constant 0 : i32
    %c0_i32_0 = arith.constant 0 : i32
    return %arg0, %c0_i32 : i32, i32
  }
  func.func @transform_3(%arg0: i32) -> (i32, i32) {
    %c0_i32 = arith.constant 0 : i32
    %c0_i32_0 = arith.constant 0 : i32
    return %arg0, %c0_i32 : i32, i32
  }
  func.func @transform_4(%arg0: i32) -> (i32, i32, i32) {
    %c0_i32 = arith.constant 0 : i32
    %c0_i32_0 = arith.constant 0 : i32
    %c0_i32_1 = arith.constant 0 : i32
    return %arg0, %c0_i32, %c0_i32_0 : i32, i32, i32
  }
  func.func @transform_5(%arg0: i32) -> (i32, i32, i32) {
    %c0_i32 = arith.constant 0 : i32
    %c0_i32_0 = arith.constant 0 : i32
    %c0_i32_1 = arith.constant 0 : i32
    return %arg0, %c0_i32, %c0_i32_0 : i32, i32, i32
  }
}

</mosaic_0001>

<bundles_post_ra>
// kernel: tc_moe_gate.1
= control target key start
LH: loop header
LB: loop body
LE: loop exit
PB: predicated region body
PF: predicated region fallthrough
CT: control target
= control target key end

     0   :  { %s757_s18 = smov 0   ;;  %s921_s0 = inlined_call_operand.vmem [shape: bf16[32,32], index: 0, kind: input, shape index: {}]   ;;  %s922_s1 = inlined_call_operand.vmem [shape: bf16[32,16], index: 1, kind: input, shape index: {}]   ;;  %s923_s2 = inlined_call_operand.vmem [shape: f32[32,2], index: 2, kind: output, shape index: {0}]   ;;  %s924_s3 = inlined_call_operand.vmem [shape: s32[32,2], index: 3, kind: output, shape index: {1}]   ;;  %s925_s4 = inlined_call_operand.vmem [shape: f32[2,8,16], index: 4, kind: output, shape index: {2}]   ;;  %s926_s5 = inlined_call_operand.vmem [shape: f32[2,8,16], index: 5, kind: output, shape index: {3}]  }
   0x1 LB: > { %s763_s19 = sadd.s32 4294967295, %s723_s18   ;;  %p669_p0 = scmp.ge.s32.totalorder %s723_s18, 1  ;;  %s723_s18 = sphi %s757_s18, %s16_s18  }
   0x2   : > { %p195_p1 = scmp.lt.s32.totalorder %s723_s18, 3 }
   0x4   : > { %p196_p2 = pnand %p669_p0, %p195_p1 }
   0x5   : > { %s670_s24 = sshll.u32 (!%p196_p2), %s763_s19, 1  ;;  %s682_s29 = sshll.u32 (!%p196_p2), %s763_s19, 4 }
   0x6   : > { %199 = sbr.rel (%p196_p2) target bundleno = 1253 (0x4e5), region = 28  ;;  %p237_p3 = scmp.lt.s32.totalorder (!%p196_p2), %s670_s24, 3 }
   0x7   : > { %p254_p4 = scmp.lt.s32.totalorder (!%p196_p2), %s763_s19, 1 }
   0xb   : > { %v706_v0 = vld [vmem:[%s922_s1 + $0x8] sm:$0xff]   ;;  %v725_v1 = vmov 0.0   ;;  %v707_v2 = vld [vmem:[%s922_s1] sm:$0xff]   ;;  %vm726_vm0 = vmmov 0   ;;  %s928_s24 = smov (!%p237_p3, %s670_s24), 3  ;;  %vm286_vm1 = vcmask 261120   ;;  %v352_v20 = vlaneseq }
   0xc   : > { %688 = vmatprep.subr.bf16.mxu0 %v725_v1  ;;  %692 = vmatprep.mubr.msk.bf16.mxu0 %vm726_vm0, %v725_v1  ;;  %s671_s25 = sshll.u32 %s928_s24, 2  ;;  %vm331_vm2 = vcmask 130048   ;;  %v358_v41 = vstv %s682_s29  ;;  %s673_s30 = sshll.u32 %s928_s24, 3 }
   0xd   : > { %689 = vmatpush3.bf16.msra.mxu0 %v706_v0  ;;  %s240_s28 = scalar_lea.vmem %s921_s0, %s671_s25  ;;  %v793_v21 = vand.u32 127, %v352_v20  ;;  %v356_v40 = vshrl.u32 %v352_v20, 7  ;;  %s246_s8 = scalar_lea.vmem %s923_s2, %s673_s30 }
   0xe   : > { %690 = vmatprep.subr.bf16.mxu0 %v725_v1  ;;  %v708_v3 = vld [vmem:[%s240_s28] sm:$0xff]   ;;  %s930_s19 = smov (!%p254_p4, %s763_s19), 1  ;;  %s252_s15 = scalar_lea.vmem %s924_s3, %s673_s30 }
   0xf   : > { %v808_v43 = vadd.s32 %v358_v41, %v356_v40  ;;  %v357_v44 = vadd.s32 8, %v356_v40  ;;  %s676_s9 = sshll.u32 %s930_s19, 3 }
  0x10   : > { %s257_s12 = scalar_lea.vmem %s925_s4, %s676_s9  ;;  %s261_s20 = scalar_lea.vmem %s926_s5, %s676_s9 }
  0x11   : > { %691 = vmatpush3.bf16.msra.mxu0 %v707_v2  ;;  %vm361_vm7 = vcmp.lt.s32.totalorder %v808_v43, 32  ;;  %v813_v50 = vadd.s32 %v358_v41, %v357_v44 }
  0x13   : > { %vm362_vm10 = vcmp.lt.s32.totalorder %v813_v50, 32 }
  0x14   : > { %693 = vmatmul.mubr.msk.bf16.vlgmr.msra.gmra.mxu0 %vm286_vm1, %v708_v3  ;;  %vm421_vm1 = vcmp.eq.s32.totalorder %v793_v21, 0 }
  0xd4   : > { %v324_v4 = vpop.f32.mrf.mxu0 }
  0xd5   : > { %v332_v5 = vsel %vm331_vm2, %v324_v4, -inf }
  0xd6   : > { %333 = vmax.xlane.f32.xlu0 %v332_v5  ;;  %v694_v6 = vpop.f32.mrf.mxu0 }
  0xd8   : > { %v327_v7 = vpop.f32.mrf.mxu0 }
  0xd9   : > { %v335_v8 = vsel %vm331_vm2, %v327_v7, -inf }
  0xda   : > { %336 = vmax.xlane.f32.xlu0 %v335_v8  ;;  %v695_v9 = vpop.f32.mrf.mxu0 }
 0x15f   : > { %v334_v10 = vpop.xlane.xlu0 %333 }
 0x160   : > { %v338_v11 = vsub.f32 %v324_v4, %v334_v10 }
 0x162   : > { %v340_v12 = vmul.f32 1.442695, %v338_v11 }
 0x163   : > { %v337_v13 = vpop.xlane.xlu0 %336 }
 0x164   : > { %709 = vpow2.f32 %v340_v12  ;;  %v339_v14 = vsub.f32 %v327_v7, %v337_v13 }
 0x166   : > { %v342_v15 = vmul.f32 1.442695, %v339_v14 }
 0x168   : > { %711 = vpow2.f32 %v342_v15 }
 0x171   : > { %v785_v16 = vpop.eup %709 }
 0x172   : > { %v381_v17 = vsel %vm331_vm2, %v785_v16, -inf  ;;  %v344_v11 = vsel %vm331_vm2, %v785_v16, 0.0 }
 0x173   : > { %382 = vmax.xlane.f32.xlu1 %v381_v17 }
 0x175   : > { %v789_v18 = vpop.eup %711 }
 0x176   : > { %v384_v19 = vsel %vm331_vm2, %v789_v18, -inf  ;;  %v347_v12 = vsel %vm331_vm2, %v789_v18, 0.0 }
 0x177   : > { %385 = vmax.xlane.f32.xlu1 %v384_v19 }
 0x1fc   : > { %v795_v22 = vpop.xlane.xlu1 %382 }
 0x1fd   : > { %vm387_vm3 = vcmp.eq.f32.partialorder %v785_v16, %v795_v22 }
 0x1fe   : > { %v389_v23 = vsel %vm387_vm3, %v793_v21, 16  ;;  %vm484_vm3 = vcmp.eq.s32.totalorder %v793_v21, 1 }
 0x1ff   : > { %v391_v24 = vsel %vm331_vm2, %v389_v23, 2147483647 }
 0x200   : > { %v801_v25 = vpop.xlane.xlu1 %385  ;;  %v393_v26 = vshra.s32 %v391_v24, 16  ;;  %v392_v32 = vand.u32 65535, %v391_v24 }
 0x201   : > { %vm388_vm4 = vcmp.eq.f32.partialorder %v789_v18, %v801_v25 }
 0x202   : > { %v390_v27 = vsel %vm388_vm4, %v793_v21, 16  ;;  %v395_v28 = vcvt.s32.f32 %v393_v26  ;;  %v394_v34 = vcvt.s32.f32 %v392_v32  ;;  %vm508_vm4 = vcmask 15360  }
 0x203   : > { %v406_v29 = vsel %vm331_vm2, %v390_v27, 2147483647 }
 0x204   : > { %396 = vmin.xlane.f32.xlu0 %v395_v28  ;;  %v408_v30 = vshra.s32 %v406_v29, 16  ;;  %v407_v35 = vand.u32 65535, %v406_v29 }
 0x206   : > { %v410_v31 = vcvt.s32.f32 %v408_v30  ;;  %v409_v38 = vcvt.s32.f32 %v407_v35 }
 0x208   : > { %411 = vmin.xlane.f32.xlu1 %v410_v31 }
 0x28d   : > { %v397_v33 = vpop.xlane.xlu0 %396 }
 0x28e   : > { %vm398_vm5 = vcmp.eq.f32.partialorder %v395_v28, %v397_v33  ;;  %v403_v42 = vcvt.f32.s32 %v397_v33  ;;  %v422_v28 = vsel %vm421_vm1, %v795_v22, 0.0  ;;  %v423_v33 = vsel %vm421_vm1, %v801_v25, 0.0 }
 0x28f   : > { %v399_v36 = vsel %vm398_vm5, %v394_v34, inf }
 0x290   : > { %400 = vmin.xlane.f32.xlu0 %v399_v36  ;;  %v404_v46 = vshll.u32 %v403_v42, 16 }
 0x291   : > { %v412_v37 = vpop.xlane.xlu1 %411 }
 0x292   : > { %vm413_vm6 = vcmp.eq.f32.partialorder %v410_v31, %v412_v37  ;;  %v418_v47 = vcvt.f32.s32 %v412_v37 }
 0x293   : > { %v414_v39 = vsel %vm413_vm6, %v409_v38, inf }
 0x294   : > { %415 = vmin.xlane.f32.xlu1 %v414_v39  ;;  %v419_v52 = vshll.u32 %v418_v47, 16 }
 0x319   : > { %v401_v45 = vpop.xlane.xlu0 %400 }
 0x31a   : > { %v402_v48 = vcvt.f32.s32 %v401_v45 }
 0x31c   : > { %v810_v49 = vadd.s32 %v404_v46, %v402_v48 }
 0x31d   : > { %v416_v51 = vpop.xlane.xlu1 %415 }
 0x31e   : > { %v417_v53 = vcvt.f32.s32 %v416_v51  ;;  %vm426_vm8 = vcmp.eq.s32.totalorder %v793_v21, %v810_v49 }
 0x31f   : > { %v442_v54 = vsel %vm426_vm8, -inf, %v785_v16  ;;  %vm428_vm9 = vmand %vm361_vm7, %vm426_vm8 }
 0x320   : > { %v820_v55 = vadd.s32 %v419_v52, %v417_v53  ;;  %v444_v56 = vsel %vm331_vm2, %v442_v54, -inf  ;;  %v430_v57 = vsel %vm428_vm9, 1.0, %v725_v1 }
 0x321   : > { %445 = vmax.xlane.f32.xlu0 %v444_v56  ;;  %v432_v61 = vsel %vm331_vm2, %v430_v57, 0.0 }
 0x322   : > { %vm427_vm11 = vcmp.eq.s32.totalorder %v793_v21, %v820_v55 }
 0x323   : > { %v443_v58 = vsel %vm427_vm11, -inf, %v789_v18  ;;  %vm429_vm12 = vmand %vm362_vm10, %vm427_vm11 }
 0x324   : > { %v447_v59 = vsel %vm331_vm2, %v443_v58, -inf  ;;  %v431_v60 = vsel %vm429_vm12, 1.0, %v725_v1 }
 0x325   : > { %448 = vmax.xlane.f32.xlu1 %v447_v59  ;;  %v433_v62 = vsel %vm331_vm2, %v431_v60, 0.0 }
 0x326   : > { %v834_v63 = vadd.f32 %v433_v62, %v432_v61 }
 0x328   : > { %v435_v56 = vrot.slane %v834_v63, 4 }
 0x32a   : > { %v436_v62 = vadd.f32 %v435_v56, %v834_v63 }
 0x32c   : > { %v437_v63 = vrot.slane %v436_v62, 2 }
 0x3aa   : > { %v446_v0 = vpop.xlane.xlu0 %445 }
 0x3ab   : > { %vm450_vm13 = vcmp.eq.f32.partialorder %v442_v54, %v446_v0  ;;  %v485_v30 = vsel %vm484_vm3, %v446_v0, %v422_v28  ;;  %v424_v54 = vsel %vm421_vm1, %v810_v49, 0  ;;  %v425_v49 = vsel %vm421_vm1, %v820_v55, 0 }
 0x3ac   : > { %v452_v2 = vsel %vm450_vm13, %v793_v21, 16 }
 0x3ad   : > { %v454_v3 = vsel %vm331_vm2, %v452_v2, 2147483647 }
 0x3ae   : > { %v449_v4 = vpop.xlane.xlu1 %448  ;;  %v456_v5 = vshra.s32 %v454_v3, 16  ;;  %v455_v13 = vand.u32 65535, %v454_v3 }
 0x3af   : > { %vm451_vm14 = vcmp.eq.f32.partialorder %v443_v58, %v449_v4  ;;  %v486_v34 = vsel %vm484_vm3, %v449_v4, %v423_v33 }
 0x3b0   : > { %v453_v6 = vsel %vm451_vm14, %v793_v21, 16  ;;  %v458_v7 = vcvt.s32.f32 %v456_v5  ;;  %v457_v15 = vcvt.s32.f32 %v455_v13 }
 0x3b1   : > { %v469_v8 = vsel %vm331_vm2, %v453_v6, 2147483647  ;;  %v438_v6 = vadd.f32 %v437_v63, %v436_v62 }
 0x3b2   : > { %459 = vmin.xlane.f32.xlu0 %v458_v7  ;;  %v471_v9 = vshra.s32 %v469_v8, 16  ;;  %v470_v17 = vand.u32 65535, %v469_v8 }
 0x3b4   : > { %v473_v10 = vcvt.s32.f32 %v471_v9  ;;  %v472_v24 = vcvt.s32.f32 %v470_v17  ;;  %v439_v9 = vrot.slane %v438_v6, 1 }
 0x3b6   : > { %474 = vmin.xlane.f32.xlu1 %v473_v10  ;;  %345 = vadd.xlane.f32.xlu0 %v344_v11  ;;  %v440_v50 = vadd.f32 %v439_v9, %v438_v6 }
 0x3ba   : > { %348 = vadd.xlane.f32.xlu1 %v347_v12 }
 0x43b   : > { %v460_v14 = vpop.xlane.xlu0 %459 }
 0x43c   : > { %vm461_vm15 = vcmp.eq.f32.partialorder %v458_v7, %v460_v14  ;;  %v466_v46 = vcvt.f32.s32 %v460_v14 }
 0x43d   : > { %v462_v19 = vsel %vm461_vm15, %v457_v15, inf }
 0x43e   : > { %463 = vmin.xlane.f32.xlu0 %v462_v19  ;;  %v467_v48 = vshll.u32 %v466_v46, 16 }
 0x43f   : > { %v475_v20 = vpop.xlane.xlu1 %474  ;;  %v346_v23 = vpop.xlane.xlu0 %345 }
 0x440   : > { %713 = vrcp.f32 %v346_v23  ;;  %vm476_vm0 = vcmp.eq.f32.partialorder %v473_v10, %v475_v20  ;;  %v481_v51 = vcvt.f32.s32 %v475_v20 }
 0x441   : > { %v477_v26 = vsel %vm476_vm0, %v472_v24, inf }
 0x442   : > { %478 = vmin.xlane.f32.xlu1 %v477_v26  ;;  %v482_v58 = vshll.u32 %v481_v51, 16 }
 0x443   : > { %v349_v27 = vpop.xlane.xlu1 %348 }
 0x444   : > { %715 = vrcp.f32 %v349_v27 }
 0x44d   : > { %v714_v29 = vpop.eup %713 }
 0x44e   : > { %v363_v31 = vmul.f32 %v714_v29, %v785_v16  ;;  %v506_v32 = vmul.f32 %v714_v29, %v485_v30 }
 0x450   : > { %509 = vst.msk [vmem:[%s246_s8] sm:$0xff] %vm508_vm4, %v506_v32  ;;  %v369_v35 = vsel %vm361_vm7, %v363_v31, 0.0 }
 0x451   : > { %v716_v22 = vpop.eup %715  ;;  %v371_v38 = vsel %vm331_vm2, %v369_v35, 0.0 }
 0x452   : > { %v364_v36 = vmul.f32 %v716_v22, %v789_v18  ;;  %v507_v37 = vmul.f32 %v716_v22, %v486_v34 }
 0x454   : > { %v370_v16 = vsel %vm362_vm10, %v364_v36, 0.0  ;;  %510 = vst.msk [vmem:[%s246_s8 + $0x8] sm:$0xff] %vm508_vm4, %v507_v37 }
 0x455   : > { %v372_v25 = vsel %vm331_vm2, %v370_v16, 0.0 }
 0x456   : > { %v373_v39 = vadd.f32 %v372_v25, %v371_v38 }
 0x458   : > { %v374_v40 = vrot.slane %v373_v39, 4 }
 0x45a   : > { %v375_v41 = vadd.f32 %v374_v40, %v373_v39 }
 0x45c   : > { %v376_v18 = vrot.slane %v375_v41, 2 }
 0x45e   : > { %v377_v42 = vadd.f32 %v376_v18, %v375_v41 }
 0x460   : > { %v378_v44 = vrot.slane %v377_v42, 1 }
 0x462   : > { %v379_v45 = vadd.f32 %v378_v44, %v377_v42 }
 0x464   : > { %380 = vst.msk [vmem:[%s257_s12] sm:$0xff] %vm331_vm2, %v379_v45 }
 0x4c7   : > { %v464_v47 = vpop.xlane.xlu0 %463 }
 0x4c8   : > { %v465_v52 = vcvt.f32.s32 %v464_v47 }
 0x4ca   : > { %v468_v53 = vadd.s32 %v467_v48, %v465_v52 }
 0x4cb   : > { %v479_v57 = vpop.xlane.xlu1 %478 }
 0x4cc   : > { %v487_v59 = vsel %vm484_vm3, %v468_v53, %v424_v54  ;;  %vm489_vm5 = vcmp.eq.s32.totalorder %v793_v21, %v468_v53  ;;  %v480_v60 = vcvt.f32.s32 %v479_v57 }
 0x4cd   : > { %vm491_vm6 = vmand %vm361_vm7, %vm489_vm5  ;;  %511 = vst.msk [vmem:[%s252_s15] sm:$0xff] %vm508_vm4, %v487_v59 }
 0x4ce   : > { %v483_v61 = vadd.s32 %v482_v58, %v480_v60  ;;  %v493_v0 = vsel %vm491_vm6, 1.0, %v725_v1 }
 0x4cf   : > { %v495_v3 = vsel %vm331_vm2, %v493_v0, 0.0 }
 0x4d0   : > { %v488_v2 = vsel %vm484_vm3, %v483_v61, %v425_v49  ;;  %vm490_vm8 = vcmp.eq.s32.totalorder %v793_v21, %v483_v61 }
 0x4d1   : > { %vm492_vm9 = vmand %vm362_vm10, %vm490_vm8  ;;  %512 = vst.msk [vmem:[%s252_s15 + $0x8] sm:$0xff] %vm508_vm4, %v488_v2 }
 0x4d2   : > { %v494_v43 = vsel %vm492_vm9, 1.0, %v725_v1 }
 0x4d3   : > { %v496_v55 = vsel %vm331_vm2, %v494_v43, 0.0 }
 0x4d4   : > { %v497_v4 = vadd.f32 %v496_v55, %v495_v3 }
 0x4d6   : > { %v498_v5 = vrot.slane %v497_v4, 4 }
 0x4d8   : > { %v499_v7 = vadd.f32 %v498_v5, %v497_v4 }
 0x4da   : > { %v500_v8 = vrot.slane %v499_v7, 2 }
 0x4dc   : > { %v501_v21 = vadd.f32 %v500_v8, %v499_v7 }
 0x4de   : > { %v502_v10 = vrot.slane %v501_v21, 1 }
 0x4e0   : > { %v503_v11 = vadd.f32 %v502_v10, %v501_v21 }
 0x4e2   : > { %v504_v1 = vadd.f32 %v503_v11, %v440_v50 }
 0x4e4   : > { %505 = vst.msk [vmem:[%s261_s20] sm:$0xff] %vm331_vm2, %v504_v1 }
 0x4e5 PF: > { %s16_s18 = sadd.s32 1, %s723_s18  }
 0x4e6   : > { %p13_p5 = scmp.ge.s32.totalorder %s16_s18, 4  }
 0x4e8   :  { %15 = sbr.rel (!%p13_p5) target bundleno = 1 (0x1), region = 94 }

</bundles_post_ra>
